<compile_context>
chip_gen: v7x
topology: tpu7x:2x2x1
jax: 0.10.0
libtpu: 0.0.40
codegen_flags: <defaults>
</compile_context>

<pallas_src>
import functools

import jax
import jax.numpy as jnp
from jax import lax
from jax.experimental import pallas as pl
from jax.experimental.pallas import tpu as pltpu


def _round_up(x, m):
    return ((x + m - 1) // m) * m


def _patch_embed_kernel(x_ref, w_ref, b_ref, o_ref):
    # x_ref: [tm, K] (compute dtype)   w_ref: [K, tn] (compute dtype)
    # b_ref: [1, tn] (f32)             o_ref: [tm, tn] (out dtype)
    acc = jnp.dot(x_ref[...], w_ref[...], preferred_element_type=jnp.float32)
    o_ref[...] = (acc + b_ref[...]).astype(o_ref.dtype)


def _vmem_capacity_bytes():
    try:
        return int(pltpu.get_tpu_info().vmem_capacity_bytes)
    except Exception:
        return 64 << 20  # conservative fallback (v7x per-TensorCore VMEM)


def patch_embed_matmul(patches, w_flat_t, bias, out_dtype):
    """patches: [M, K], w_flat_t: [K, E] (compute dtype), bias: [E] -> [M, E] out_dtype."""
    M, K = patches.shape
    Kw, E = w_flat_t.shape
    assert Kw == K

    # ---- E tiling: single resident [K, E] weight tile whenever it fits a few
    # MiB of VMEM (e.g. ViT-H 768x1280 bf16 ~ 2.3 MiB). A single E tile streams
    # the [M, K] patch matrix from HBM exactly once and needs no E padding.
    single_tile_budget = 6 << 20
    w_bytes_per_col = K * w_flat_t.dtype.itemsize
    if E * w_bytes_per_col <= single_tile_budget:
        tn, Ep = E, E
    else:
        # Rare fallback (very large K*E): largest 128-multiple tile dividing the
        # 128-padded E, so re-streaming of the patch matrix is minimized.
        Ep = _round_up(E, 128)
        max_tn = max(128, (single_tile_budget // w_bytes_per_col) // 128 * 128)
        tn, cand = 128, max_tn
        while cand >= 128:
            if Ep % cand == 0:
                tn = cand
                break
            cand -= 128
        if Ep != E:
            w_flat_t = jnp.pad(w_flat_t, ((0, 0), (0, Ep - E)))

    bias2 = bias.astype(jnp.float32).reshape(1, E)
    if Ep != E:
        bias2 = jnp.pad(bias2, ((0, 0), (0, Ep - E)))

    # ---- M tiling: large tile to amortize ~0.35us per-grid-step overhead;
    # multiple of 16 (bf16 sublane packing) and of 256 (v6e/v7x MXU) when large.
    tm = min(1024, _round_up(M, 16))
    # E outermost: weight/bias block index is constant across the inner M sweep,
    # so they are DMA'd once per E tile and stay VMEM-resident.
    grid = (Ep // tn, pl.cdiv(M, tm))

    # ---- VMEM budget: double-buffered tiles + f32 matmul accumulator,
    # capped relative to this generation's actual VMEM capacity.
    in_b = patches.dtype.itemsize
    out_b = jnp.dtype(out_dtype).itemsize
    est = (2 * tm * K * in_b          # patch tiles (double-buffered)
           + 2 * K * tn * in_b        # weight tile (double-buffered)
           + 2 * tn * 4               # bias
           + 2 * tm * tn * out_b      # output tile (double-buffered)
           + tm * tn * 4)             # f32 accumulator intermediate
    vmem_cap = _vmem_capacity_bytes()
    vmem_limit = int(min(max(2 * est, 16 << 20), (vmem_cap * 3) // 4))

    out = pl.pallas_call(
        _patch_embed_kernel,
        # Unpadded M: Pallas masks the edge output block, so no slice copy after.
        out_shape=jax.ShapeDtypeStruct((M, Ep), out_dtype),
        grid_spec=pltpu.PrefetchScalarGridSpec(
            num_scalar_prefetch=0,
            grid=grid,
            in_specs=[
                pl.BlockSpec((tm, K), lambda j, i: (i, 0)),   # patches
                pl.BlockSpec((K, tn), lambda j, i: (0, j)),   # weight (resident over i)
                pl.BlockSpec((1, tn), lambda j, i: (0, j)),   # bias   (resident over i)
            ],
            out_specs=pl.BlockSpec((tm, tn), lambda j, i: (i, j)),
        ),
        compiler_params=pltpu.CompilerParams(
            # E axis "arbitrary" so the v7x megacore split lands on the M axis.
            dimension_semantics=("arbitrary", "parallel"),
            vmem_limit_bytes=vmem_limit,
        ),
    )(patches, w_flat_t, bias2)

    if Ep != E:
        out = out[:, :E]
    return out


def prepare_patch_embed_weight(weight, compute_dtype=jnp.bfloat16):
    """Pre-flatten/cast the PyTorch Conv2d weight [E, C, ph, pw] -> [K, E] once (at init)."""
    E = weight.shape[0]
    return jnp.asarray(weight).reshape(E, -1).T.astype(compute_dtype)


def patch_embed_forward(x, weight, bias, patch_size,
                        compute_dtype=jnp.bfloat16, out_dtype=None):
    """
    x:      [B, C, H, W]    (NCHW, like PyTorch)
    weight: [E, C, ph, pw]  (PyTorch Conv2d layout) or pre-flattened [K, E]
    bias:   [E]
    returns [B, num_patches, E] in out_dtype (default: x.dtype)
    """
    B, C, H, W = x.shape
    ph, pw = patch_size
    if H % ph != 0 or W % pw != 0:
        raise ValueError("Input image size doesn't match patch size")
    Hp, Wp = H // ph, W // pw
    N = Hp * Wp
    K = C * ph * pw
    if out_dtype is None:
        out_dtype = x.dtype

    w = jnp.asarray(weight)
    if w.ndim == 4:
        E = w.shape[0]
        w_flat_t = w.reshape(E, K).T.astype(compute_dtype)   # fallback: flatten in-jit
    else:
        E = w.shape[1]
        w_flat_t = w.astype(compute_dtype)                   # already [K, E]

    # Patch extraction (im2col for a stride==kernel conv); cast + transpose fuse
    # in XLA into one read-f32 / write-bf16 pass over the activations.
    # TODO(synk): fuse this im2col into the kernel (grid over (B, Hp) row strips
    # with an in-VMEM regroup) to remove the patch-matrix HBM round trip.
    xc = x.astype(compute_dtype)
    xp = xc.reshape(B, C, Hp, ph, Wp, pw).transpose(0, 2, 4, 1, 3, 5)
    patches = xp.reshape(B * N, K)                            # [M, K]

    out = patch_embed_matmul(patches, w_flat_t, bias, out_dtype)   # [M, E]
    return out.reshape(B, N, E)                               # free: no padding to slice


def _reference(x, weight, bias, patch_size):
    ph, pw = patch_size
    E = weight.shape[0]
    ref = lax.conv_general_dilated(
        x, weight, window_strides=(ph, pw), padding="VALID",
        dimension_numbers=("NCHW", "OIHW", "NCHW"),
        precision=lax.Precision.HIGHEST,
    ) + bias.reshape(1, E, 1, 1)
    B = x.shape[0]
    return ref.reshape(B, E, -1).transpose(0, 2, 1)           # flatten(2).transpose(1, 2)


if __name__ == "__main__":
    # --- Small shapes: batch=2, in_ch=4, img_size=16, patch_size=4, embed_dim=32 ---
    B, C, H, W = 2, 4, 16, 16
    ph = pw = 4
    E = 32
    kx, kw, kb = jax.random.split(jax.random.PRNGKey(0), 3)
    x = jax.random.normal(kx, (B, C, H, W), dtype=jnp.float32)
    weight = jax.random.normal(kw, (E, C, ph, pw), dtype=jnp.float32) * 0.02
    bias = jax.random.normal(kb, (E,), dtype=jnp.float32) * 0.02

    # Weight flattened/cast once, outside the jitted forward (feedback item).
    w_flat_t = prepare_patch_embed_weight(weight)

    fwd = jax.jit(functools.partial(patch_embed_forward, patch_size=(ph, pw)))
    out = jax.block_until_ready(fwd(x, w_flat_t, bias))
    assert out.shape == (B, (H // ph) * (W // pw), E)
    ref = _reference(x, weight, bias, (ph, pw))
    # bf16 MXU operands with f32 accumulation -> loosened tolerance.
    assert jnp.allclose(out, ref, atol=2e-2, rtol=2e-2), float(jnp.abs(out - ref).max())

    # --- ViT-B/16-sized check: exercises the multi-M-tile + masked-edge path ---
    B2, C2, H2, W2 = 8, 3, 224, 224
    ph2 = pw2 = 16
    E2 = 768
    kx2, kw2, kb2 = jax.random.split(jax.random.PRNGKey(1), 3)
    x2 = jax.random.normal(kx2, (B2, C2, H2, W2), dtype=jnp.float32)
    weight2 = jax.random.normal(kw2, (E2, C2, ph2, pw2), dtype=jnp.float32) * 0.02
    bias2 = jax.random.normal(kb2, (E2,), dtype=jnp.float32) * 0.02
    w_flat_t2 = prepare_patch_embed_weight(weight2)

    fwd2 = jax.jit(functools.partial(patch_embed_forward, patch_size=(ph2, pw2)))
    out2 = jax.block_until_ready(fwd2(x2, w_flat_t2, bias2))
    assert out2.shape == (B2, (H2 // ph2) * (W2 // pw2), E2)
    ref2 = _reference(x2, weight2, bias2, (ph2, pw2))
    assert jnp.allclose(out2, ref2, atol=5e-2, rtol=5e-2), float(jnp.abs(out2 - ref2).max())

    print("KERNEL_OK")
</pallas_src>

<mosaic_0001>
module attributes {stable_mosaic.version = 11 : i64} {
  func.func @_patch_embed_kernel(%arg0: i32, %arg1: i32, %arg2: memref<32x64xbf16, #tpu.memory_space<vmem>>, %arg3: memref<64x32xbf16, #tpu.memory_space<vmem>>, %arg4: memref<1x32xf32, #tpu.memory_space<vmem>>, %arg5: memref<32x32xf32, #tpu.memory_space<vmem>>) attributes {dimension_semantics = [#tpu.dimension_semantics<arbitrary>, #tpu.dimension_semantics<parallel>], iteration_bounds = array<i64: 1, 1>, scalar_prefetch = 0 : i64, scratch_operands = 0 : i64, tpu.core_type = #tpu.core_type<tc>, window_params = [{transform_indices = @transform_0, window_bounds = array<i64: 32, 64>}, {transform_indices = @transform_1, window_bounds = array<i64: 64, 32>}, {transform_indices = @transform_2, window_bounds = array<i64: 1, 32>}, {transform_indices = @transform_3, window_bounds = array<i64: 32, 32>}]} {
    %c0 = arith.constant 0 : index
    %c0_0 = arith.constant 0 : index
    %0 = vector.load %arg2[%c0, %c0_0] : memref<32x64xbf16, #tpu.memory_space<vmem>>, vector<32x64xbf16>
    %c0_1 = arith.constant 0 : index
    %c0_2 = arith.constant 0 : index
    %1 = vector.load %arg3[%c0_1, %c0_2] : memref<64x32xbf16, #tpu.memory_space<vmem>>, vector<64x32xbf16>
    %cst = arith.constant dense<0.000000e+00> : vector<32x32xf32>
    %2 = tpu.matmul %0, %1, %cst {dimension_numbers = #tpu.dot_dimension_numbers<[1], [0], [0], [1], [0, 0, 1, 1], [], []>} : vector<32x64xbf16>, vector<64x32xbf16>, vector<32x32xf32> -> vector<32x32xf32>
    %c0_3 = arith.constant 0 : index
    %c0_4 = arith.constant 0 : index
    %3 = vector.load %arg4[%c0_3, %c0_4] : memref<1x32xf32, #tpu.memory_space<vmem>>, vector<1x32xf32>
    %4 = vector.broadcast %3 : vector<1x32xf32> to vector<32x32xf32>
    %5 = arith.addf %2, %4 : vector<32x32xf32>
    %c0_5 = arith.constant 0 : index
    %c0_6 = arith.constant 0 : index
    %6 = vector.load %arg5[%c0_5, %c0_6] : memref<32x32xf32, #tpu.memory_space<vmem>>, vector<32x32xf32>
    tpu.vector_store %arg5[%c0_5, %c0_6], %5 {strides = array<i32>} : memref<32x32xf32, #tpu.memory_space<vmem>>, vector<32x32xf32>,
    return
  }
  func.func @transform_0(%arg0: i32, %arg1: i32) -> (i32, i32) {
    %c0_i32 = arith.constant 0 : i32
    %c0_i32_0 = arith.constant 0 : i32
    return %arg1, %c0_i32 : i32, i32
  }
  func.func @transform_1(%arg0: i32, %arg1: i32) -> (i32, i32) {
    %c0_i32 = arith.constant 0 : i32
    %c0_i32_0 = arith.constant 0 : i32
    return %c0_i32, %arg0 : i32, i32
  }
  func.func @transform_2(%arg0: i32, %arg1: i32) -> (i32, i32) {
    %c0_i32 = arith.constant 0 : i32
    %c0_i32_0 = arith.constant 0 : i32
    return %c0_i32, %arg0 : i32, i32
  }
  func.func @transform_3(%arg0: i32, %arg1: i32) -> (i32, i32) {
    %c0_i32 = arith.constant 0 : i32
    return %arg1, %arg0 : i32, i32
  }
}

</mosaic_0001>

<bundles_post_ra>
// kernel: patch_embed_forward.1
= control target key start
LH: loop header
LB: loop body
LE: loop exit
PB: predicated region body
PF: predicated region fallthrough
CT: control target
= control target key end

     0   :  { %vm69_vm0 = vcmask 523264   ;;  %s262_s0 = inlined_call_operand.vmem [shape: bf16[32,64], index: 0, kind: input, shape index: {}]   ;;  %s263_s1 = inlined_call_operand.vmem [shape: bf16[64,32], index: 1, kind: input, shape index: {}]   ;;  %s264_s2 = inlined_call_operand.vmem [shape: f32[1,32], index: 2, kind: input, shape index: {}]   ;;  %s265_s3 = inlined_call_operand.hbm [shape: f32[32,32], index: 3, kind: output, shape index: {}]  }
   0x1   :  { %v176_v0 = vld [vmem:[%s263_s1] sm:$0xff]   ;;  %v177_v1 = vld [vmem:[%s263_s1 + $0x8] sm:$0xff]   ;;  %v178_v2 = vld [vmem:[%s263_s1 + $0x10] sm:$0xff]  }
   0x2   :  { %161 = vmatprep.subr.bf16.mxu0 %v176_v0  ;;  %v180_v3 = vld [vmem:[%s262_s0] sm:$0xff]  }
   0x3   :  { %162 = vmatpush3.bf16.msra.mxu0 %v176_v0  ;;  %169 = vmatprep.mubr.msk.bf16.mxu0 %vm69_vm0, %v180_v3 }
   0x4   :  { %163 = vmatprep.subr.bf16.mxu0 %v177_v1 }
   0x5   :  { %8 = vsyncpa [#allocation3], 0  ;;  %v179_v4 = vld [vmem:[%s263_s1 + $0x18] sm:$0xff]   ;;  %v181_v5 = vld [vmem:[%s262_s0 + $0x8] sm:$0xff]   ;;  %vm125_vm1 = vcmask 261120   ;;  %s206_s26 = smov [#allocation2]  }
   0x6   :  { %v146_v6 = vld [vmem:[%s264_s2] ss:$0 sm:$0xff]  ;;  %s135_s27 = sshll.u32 %s206_s26, 4  ;;  %s136_s27 = int_to_ptr.vmem [resolvable:$true] %s135_s27 }
   0x7   :  { %164 = vmatpush3.bf16.msra.mxu0 %v177_v1  ;;  %s182_s0 = scalar_lea.vmem %s136_s27, 512  ;;  %p187_p1 = scmp.lt.s32.totalorder %s136_s27, %s136_s27 }
   0x8   :  { %165 = vmatprep.subr.bf16.mxu0 %v178_v2  ;;  %p183_p0 = scmp.ne.s32.totalorder %s136_s27, %s182_s0  ;;  %p188_p2 = scmp.lt.s32.totalorder %s182_s0, %s182_s0 }
   0xa   :  { %p189_p3 = por %p188_p2, %p187_p1 }
   0xb   :  { %166 = vmatpush3.bf16.msra.mxu0 %v178_v2 }
   0xc   :  { %167 = vmatprep.subr.bf16.mxu0 %v179_v4  ;;  %p190_p4 = pnand %p189_p3, %p183_p0 }
   0xf   :  { %168 = vmatpush3.bf16.msra.mxu0 %v179_v4 }
  0x12   :  { %170 = vmatmul.mubr.msk.bf16.vlgmr.msra.gmra.mrb[0].mxu0 %vm69_vm0, %v181_v5 }
  0xe5   :  { %v171_v7 = vpop.f32.mrb[0].mxu0 }
  0xe6   :  { %v119_v8 = vadd.f32 %v171_v7, %v146_v6  ;;  %v110_v9 = vpop.f32.mrb[1].mxu0 }
  0xe7   :  { %v111_v10 = vadd.f32 %v146_v6, %v110_v9  ;;  %v172_v11 = vpop.f32.mrb[2].mxu0 }
  0xe8   :  { %128 = vst.msk [vmem:[#allocation2 + $0x10] sm:$0xff] %vm125_vm1, %v119_v8  ;;  %v122_v12 = vadd.f32 %v172_v11, %v146_v6  ;;  %v113_v13 = vpop.f32.mrb[3].mxu0 }
  0xe9   :  { %126 = vst.msk [vmem:[#allocation2] sm:$0xff] %vm125_vm1, %v111_v10  ;;  %v114_v14 = vadd.f32 %v146_v6, %v113_v13 }
  0xea   :  { %129 = vst.msk [vmem:[#allocation2 + $0x18] sm:$0xff] %vm125_vm1, %v122_v12 }
  0xeb   :  { %127 = vst.msk [vmem:[#allocation2 + $0x8] sm:$0xff] %vm125_vm1, %v114_v14 }
  0xec   :  { %193 = shalt.err (!%p190_p4)
}
  0xed   :  { %s194_s28 = scalar_lea.hbm %s265_s3, 512 }
  0xee   :  { %p195_p5 = scmp.ne.s32.totalorder %s265_s3, %s194_s28  ;;  %p198_p6 = scmp.lt.u32.totalorder %s194_s28, %s265_s3 }
  0xf0   :  { %p200_p7 = pnand %p198_p6, %p195_p5 }
  0xf2   :  { %203 = shalt.err (!%p200_p7)
}
  0xf3   :  { %s207_s6 = smov 128   ;;  %s208_s7 = smov 8  }
  0xf4   :  { %141 = dma.vmem_to_hbm [thread:$0]  %s136_s27, 512, %s265_s3, [#allocation3], %s207_s6, %s207_s6, %s208_s7  }
  0xf5   :  { %204 = dma.done.wait [#allocation3], 512  }
  0xf6   :  { %205 = vsyncadd [#allocation3], 4294966784 }
  0xf7   :  { %145 = vsyncpa [#allocation3], 1 }

</bundles_post_ra>
